<compile_context>
chip_gen: v7x
topology: tpu7x:2x2x1
jax: 0.10.0
libtpu: 0.0.40
codegen_flags: <defaults>
</compile_context>

<pallas_src>
import functools

import jax
import jax.numpy as jnp
from jax.experimental import pallas as pl
from jax.experimental.pallas import tpu as pltpu

_VMEM_LIMIT = 32 * 1024 * 1024  # safe on v5e/v6e (128 MiB) and v7x (64 MiB)
_BN_EPS = 1e-5                  # PyTorch BatchNorm1d default


def _round_up(n, m):
    return ((n + m - 1) // m) * m


def _choose_tile(n, pref=512):
    """Row/reduction tile over nodes: multiple of 128 lanes (and of the 16-row bf16
    sublane quantum). 512 reaches ~85% of HBM roofline per measured Pallas scaling."""
    if n <= pref:
        return _round_up(max(n, 1), 128)
    return pref


# ---------------------------------------------------------------------------
# Fused GIN layer kernel:
#   grid = (row_tiles, k_tiles); k (reduction over source nodes) is innermost.
#   acc[i]  = 0                              (k == 0)
#   acc[i] += (A+I)[i, k] @ h[k]             (every k; int8 -> bf16 in VMEM, f32 acc)
#   at k == last:
#     y[i]  = ReLU(ReLU(acc @ W1 + b1) @ W2 + b2)      (emitted as bf16)
#     per-tile BatchNorm column sum / sum-of-squares (padded rows masked via mask input)
# ---------------------------------------------------------------------------
def _gin_layer_kernel(adj_ref, hk_ref, mask_ref, w1_ref, b1_ref, w2_ref, b2_ref,
                      y_ref, sum_ref, sq_ref, acc_ref, *, last_k):
    # program_id only at the top level of the kernel body (never inside pl.when).
    k = pl.program_id(1)

    @pl.when(k == 0)
    def _init():
        acc_ref[...] = jnp.zeros_like(acc_ref)

    # (A + I) @ h : the +I is folded into the adjacency diagonal host-side; the int8
    # adjacency tile is upcast to bf16 in VMEM (idle VPU slots) right before the MXU dot.
    acc_ref[...] += jnp.dot(adj_ref[...].astype(jnp.bfloat16), hk_ref[...],
                            preferred_element_type=jnp.float32)

    @pl.when(k == last_k)
    def _finalize():
        h_agg = acc_ref[...]
        z1 = jnp.dot(h_agg.astype(jnp.bfloat16), w1_ref[...],
                     preferred_element_type=jnp.float32) + b1_ref[...]
        z1 = jnp.maximum(z1, 0.0)
        z2 = jnp.dot(z1.astype(jnp.bfloat16), w2_ref[...],
                     preferred_element_type=jnp.float32) + b2_ref[...]
        y = jnp.maximum(z2, 0.0)          # post-MLP ReLU (pre-BatchNorm activation)
        y_ref[...] = y.astype(y_ref.dtype)

        # BatchNorm batch statistics for this row tile; padded rows carry mask == 0.
        yv = y * mask_ref[...]
        sum_ref[...] = jnp.sum(yv, axis=0, keepdims=True)[None]       # (1, 1, H)
        sq_ref[...] = jnp.sum(yv * yv, axis=0, keepdims=True)[None]   # (1, 1, H)


def gin_layer(h_bf, adj_i8, mask, n_real, w1, b1, w2, b2, gamma, beta, *, tile):
    """One GIN layer: fused aggregate+MLP+ReLU+stats kernel; BN affine applied as XLA."""
    np_, din = h_bf.shape
    hdim = w1.shape[1]
    g = np_ // tile

    w1_bf = w1.astype(jnp.bfloat16)
    w2_bf = w2.astype(jnp.bfloat16)
    b1r = b1.reshape(1, hdim).astype(jnp.float32)
    b2r = b2.reshape(1, hdim).astype(jnp.float32)

    kern = functools.partial(_gin_layer_kernel, last_k=g - 1)
    y, col_sum, col_sq = pl.pallas_call(
        kern,
        out_shape=(
            jax.ShapeDtypeStruct((np_, hdim), jnp.bfloat16),  # pre-BN activation (bf16)
            jax.ShapeDtypeStruct((g, 1, hdim), jnp.float32),  # per-tile column sums
            jax.ShapeDtypeStruct((g, 1, hdim), jnp.float32),  # per-tile column sum-squares
        ),
        grid=(g, g),
        in_specs=[
            pl.BlockSpec((tile, tile), lambda i, k: (i, k)),   # (A+I)[i, k]  (int8)
            pl.BlockSpec((tile, din), lambda i, k: (k, 0)),    # h[k]         (bf16)
            pl.BlockSpec((tile, 1), lambda i, k: (i, 0)),      # row validity mask (f32)
            pl.BlockSpec((din, hdim), lambda i, k: (0, 0)),    # W1           (bf16)
            pl.BlockSpec((1, hdim), lambda i, k: (0, 0)),      # b1           (f32)
            pl.BlockSpec((hdim, hdim), lambda i, k: (0, 0)),   # W2           (bf16)
            pl.BlockSpec((1, hdim), lambda i, k: (0, 0)),      # b2           (f32)
        ],
        out_specs=(
            pl.BlockSpec((tile, hdim), lambda i, k: (i, 0)),
            pl.BlockSpec((1, 1, hdim), lambda i, k: (i, 0, 0)),
            pl.BlockSpec((1, 1, hdim), lambda i, k: (i, 0, 0)),
        ),
        scratch_shapes=[pltpu.VMEM((tile, din), jnp.float32)],
        compiler_params=pltpu.CompilerParams(
            dimension_semantics=("parallel", "arbitrary"),
            vmem_limit_bytes=_VMEM_LIMIT,
        ),
    )(adj_i8, h_bf, mask, w1_bf, b1r, w2_bf, b2r)

    # BatchNorm1d (training mode, biased variance): tiny [H]-sized XLA glue; the affine
    # apply below is plain XLA elementwise and fuses (no extra Pallas round-trip).
    s = jnp.sum(col_sum.reshape(g, hdim), axis=0)
    ss = jnp.sum(col_sq.reshape(g, hdim), axis=0)
    mean = s / n_real
    var = jnp.maximum(ss / n_real - mean * mean, 0.0)
    inv = jax.lax.rsqrt(var + _BN_EPS)
    scale = (gamma.astype(jnp.float32) * inv).reshape(1, hdim)
    shift = (beta.astype(jnp.float32) - mean * gamma.astype(jnp.float32) * inv).reshape(1, hdim)
    h_out = y.astype(jnp.float32) * scale + shift
    return h_out


# ---------------------------------------------------------------------------
# Parameter init (deterministic, mimics xavier_uniform_ + zero bias of init_emb).
# ---------------------------------------------------------------------------
def _xavier_uniform(key, fan_in, fan_out):
    bound = (6.0 / (fan_in + fan_out)) ** 0.5
    # stored as [in, out] so forward is x @ W (== PyTorch x @ W.T with W [out, in])
    return jax.random.uniform(key, (fan_in, fan_out), jnp.float32, -bound, bound)


def init_params(key, num_features, hidden_dim, num_gc_layers):
    params = {"W1": [], "b1": [], "W2": [], "b2": [], "gamma": [], "beta": []}
    for l in range(num_gc_layers):
        in_dim = num_features if l == 0 else hidden_dim
        key, k1, k2 = jax.random.split(key, 3)
        params["W1"].append(_xavier_uniform(k1, in_dim, hidden_dim))
        params["b1"].append(jnp.zeros((hidden_dim,), jnp.float32))
        params["W2"].append(_xavier_uniform(k2, hidden_dim, hidden_dim))
        params["b2"].append(jnp.zeros((hidden_dim,), jnp.float32))
        params["gamma"].append(jnp.ones((hidden_dim,), jnp.float32))
        params["beta"].append(jnp.zeros((hidden_dim,), jnp.float32))
    # proj_head (Linear, ReLU, Linear) is constructed/initialised in __init__ but is
    # NOT used by simclr.forward; initialise it here for fidelity only.
    emb = hidden_dim * num_gc_layers
    key, kp1, kp2 = jax.random.split(key, 3)
    params["proj_W1"] = _xavier_uniform(kp1, emb, emb)
    params["proj_b1"] = jnp.zeros((emb,), jnp.float32)
    params["proj_W2"] = _xavier_uniform(kp2, emb, emb)
    params["proj_b2"] = jnp.zeros((emb,), jnp.float32)
    return params


# ---------------------------------------------------------------------------
# Forward pass: simclr.forward == Encoder.forward(...)[0]  (x_group).
# x_pool / pooling matrix / num_graphs host-sync are NOT computed (dead work).
# ---------------------------------------------------------------------------
def simclr_forward(params, x, edge_index, batch, hidden_dim, num_gc_layers,
                   *, tile_pref=512):
    del batch, hidden_dim  # only needed for x_pool (discarded by simclr.forward)
    n, din0 = x.shape
    tile = _choose_tile(n, tile_pref)
    np_ = _round_up(n, tile)  # padded node count (multiple of the row tile)

    # Dense message-passing operator A[target, source] built directly in int8 (1 byte);
    # the GIN "+I" (eps=0) is folded into the diagonal of the real nodes so no separate
    # self-term stream is needed in the kernel.
    # TODO(synk): sparse scalar-prefetched CSR segment-sum aggregation for large |V|.
    src = edge_index[0]
    dst = edge_index[1]
    adj = jnp.zeros((np_, np_), jnp.int8)
    adj = adj.at[dst, src].add(1)
    diag = jnp.arange(n)
    adj = adj.at[diag, diag].add(1)

    # Row-validity mask (1 for real nodes, 0 for padding) used for BatchNorm statistics.
    mask = (jnp.arange(np_) < n).astype(jnp.float32).reshape(np_, 1)

    # bf16 inter-layer activations (f32 kept only for the final concatenated x_group).
    h_bf = jnp.zeros((np_, din0), jnp.bfloat16).at[:n, :].set(x.astype(jnp.bfloat16))

    layer_outputs = []
    for l in range(num_gc_layers):
        h_f32 = gin_layer(h_bf, adj, mask, n,
                          params["W1"][l], params["b1"][l],
                          params["W2"][l], params["b2"][l],
                          params["gamma"][l], params["beta"][l],
                          tile=tile)
        layer_outputs.append(h_f32[:n])
        h_bf = h_f32.astype(jnp.bfloat16)

    x_group = jnp.concatenate(layer_outputs, axis=1)  # [N, hidden * num_gc_layers]
    return x_group


if __name__ == "__main__":
    key = jax.random.PRNGKey(0)

    # Small synthetic graph batch: 2 ring graphs of 4 nodes each (8 nodes total).
    num_nodes = 8
    num_features = 4
    hidden_dim = 32
    num_gc_layers = 3

    src = jnp.array([0, 1, 2, 3, 4, 5, 6, 7], dtype=jnp.int32)
    dst = jnp.array([1, 2, 3, 0, 5, 6, 7, 4], dtype=jnp.int32)
    edge_index = jnp.stack(
        [jnp.concatenate([src, dst]), jnp.concatenate([dst, src])], axis=0)   # [2, 16]
    batch = jnp.array([0, 0, 0, 0, 1, 1, 1, 1], dtype=jnp.int32)              # [8]

    key, kx = jax.random.split(key)
    x = jax.random.normal(kx, (num_nodes, num_features), jnp.float32)         # [8, 4]

    params = init_params(key, num_features, hidden_dim, num_gc_layers)

    x_group = simclr_forward(params, x, edge_index, batch, hidden_dim, num_gc_layers)
    x_group = jax.block_until_ready(x_group)
    assert x_group.shape == (num_nodes, hidden_dim * num_gc_layers)
    print("KERNEL_OK")
</pallas_src>

<mosaic_0001>
module attributes {stable_mosaic.version = 11 : i64} {
  func.func @_gin_layer_kernel(%arg0: i32, %arg1: i32, %arg2: memref<128x128xi8, #tpu.memory_space<vmem>>, %arg3: memref<128x4xbf16, #tpu.memory_space<vmem>>, %arg4: memref<128x1xf32, #tpu.memory_space<vmem>>, %arg5: memref<4x32xbf16, #tpu.memory_space<vmem>>, %arg6: memref<1x32xf32, #tpu.memory_space<vmem>>, %arg7: memref<32x32xbf16, #tpu.memory_space<vmem>>, %arg8: memref<1x32xf32, #tpu.memory_space<vmem>>, %arg9: memref<128x32xbf16, #tpu.memory_space<vmem>>, %arg10: memref<1x1x32xf32, #tpu.memory_space<vmem>>, %arg11: memref<1x1x32xf32, #tpu.memory_space<vmem>>, %arg12: memref<128x4xf32, #tpu.memory_space<vmem>>) attributes {dimension_semantics = [#tpu.dimension_semantics<parallel>, #tpu.dimension_semantics<arbitrary>], iteration_bounds = array<i64: 1, 1>, scalar_prefetch = 0 : i64, scratch_operands = 1 : i64, tpu.core_type = #tpu.core_type<tc>, window_params = [{transform_indices = @transform_0, window_bounds = array<i64: 128, 128>}, {transform_indices = @transform_1, window_bounds = array<i64: 128, 4>}, {transform_indices = @transform_2, window_bounds = array<i64: 128, 1>}, {pipeline_mode = #tpu.pipeline_mode<synchronous>, transform_indices = @transform_3, window_bounds = array<i64: 4, 32>}, {pipeline_mode = #tpu.pipeline_mode<synchronous>, transform_indices = @transform_4, window_bounds = array<i64: 1, 32>}, {pipeline_mode = #tpu.pipeline_mode<synchronous>, transform_indices = @transform_5, window_bounds = array<i64: 32, 32>}, {pipeline_mode = #tpu.pipeline_mode<synchronous>, transform_indices = @transform_6, window_bounds = array<i64: 1, 32>}, {transform_indices = @transform_7, window_bounds = array<i64: 128, 32>}, {transform_indices = @transform_8, window_bounds = array<i64: 1, 1, 32>}, {transform_indices = @transform_9, window_bounds = array<i64: 1, 1, 32>}]} {
    %c0_i32 = arith.constant 0 : i32
    %0 = arith.cmpi eq, %arg1, %c0_i32 : i32
    %1 = arith.extui %0 : i1 to i32
    %c0_i32_0 = arith.constant 0 : i32
    %2 = arith.cmpi ne, %1, %c0_i32_0 : i32
    scf.if %2 {
      %cst_10 = arith.constant 0.000000e+00 : f32
      %13 = vector.broadcast %cst_10 : f32 to vector<128x4xf32>
      %c0_11 = arith.constant 0 : index
      %c0_12 = arith.constant 0 : index
      %14 = vector.load %arg12[%c0_11, %c0_12] : memref<128x4xf32, #tpu.memory_space<vmem>>, vector<128x4xf32>
      tpu.vector_store %arg12[%c0_11, %c0_12], %13 {strides = array<i32>} : memref<128x4xf32, #tpu.memory_space<vmem>>, vector<128x4xf32>,
    } else {
    }
    %c0 = arith.constant 0 : index
    %c0_1 = arith.constant 0 : index
    %3 = vector.load %arg12[%c0, %c0_1] : memref<128x4xf32, #tpu.memory_space<vmem>>, vector<128x4xf32>
    %c0_2 = arith.constant 0 : index
    %c0_3 = arith.constant 0 : index
    %4 = vector.load %arg2[%c0_2, %c0_3] : memref<128x128xi8, #tpu.memory_space<vmem>>, vector<128x128xi8>
    %5 = arith.sitofp %4 : vector<128x128xi8> to vector<128x128xbf16>
    %c0_4 = arith.constant 0 : index
    %c0_5 = arith.constant 0 : index
    %6 = vector.load %arg3[%c0_4, %c0_5] : memref<128x4xbf16, #tpu.memory_space<vmem>>, vector<128x4xbf16>
    %cst = arith.constant dense<0.000000e+00> : vector<128x4xf32>
    %7 = tpu.matmul %5, %6, %cst {dimension_numbers = #tpu.dot_dimension_numbers<[1], [0], [0], [1], [0, 0, 1, 1], [], []>} : vector<128x128xbf16>, vector<128x4xbf16>, vector<128x4xf32> -> vector<128x4xf32>
    %8 = arith.addf %3, %7 : vector<128x4xf32>
    %c0_6 = arith.constant 0 : index
    %c0_7 = arith.constant 0 : index
    %9 = vector.load %arg12[%c0_6, %c0_7] : memref<128x4xf32, #tpu.memory_space<vmem>>, vector<128x4xf32>
    tpu.vector_store %arg12[%c0_6, %c0_7], %8 {strides = array<i32>} : memref<128x4xf32, #tpu.memory_space<vmem>>, vector<128x4xf32>,
    %c0_i32_8 = arith.constant 0 : i32
    %10 = arith.cmpi eq, %arg1, %c0_i32_8 : i32
    %11 = arith.extui %10 : i1 to i32
    %c0_i32_9 = arith.constant 0 : i32
    %12 = arith.cmpi ne, %11, %c0_i32_9 : i32
    scf.if %12 {
      %c0_10 = arith.constant 0 : index
      %c0_11 = arith.constant 0 : index
      %13 = vector.load %arg12[%c0_10, %c0_11] : memref<128x4xf32, #tpu.memory_space<vmem>>, vector<128x4xf32>
      %14 = arith.truncf %13 : vector<128x4xf32> to vector<128x4xbf16>
      %c0_12 = arith.constant 0 : index
      %c0_13 = arith.constant 0 : index
      %15 = vector.load %arg5[%c0_12, %c0_13] : memref<4x32xbf16, #tpu.memory_space<vmem>>, vector<4x32xbf16>
      %cst_14 = arith.constant dense<0.000000e+00> : vector<128x32xf32>
      %16 = tpu.matmul %14, %15, %cst_14 {dimension_numbers = #tpu.dot_dimension_numbers<[1], [0], [0], [1], [0, 0, 1, 1], [], []>} : vector<128x4xbf16>, vector<4x32xbf16>, vector<128x32xf32> -> vector<128x32xf32>
      %c0_15 = arith.constant 0 : index
      %c0_16 = arith.constant 0 : index
      %17 = vector.load %arg6[%c0_15, %c0_16] : memref<1x32xf32, #tpu.memory_space<vmem>>, vector<1x32xf32>
      %18 = vector.broadcast %17 : vector<1x32xf32> to vector<128x32xf32>
      %19 = arith.addf %16, %18 : vector<128x32xf32>
      %cst_17 = arith.constant 0.000000e+00 : f32
      %20 = vector.broadcast %cst_17 : f32 to vector<128x32xf32>
      %21 = arith.maximumf %19, %20 : vector<128x32xf32>
      %22 = arith.truncf %21 : vector<128x32xf32> to vector<128x32xbf16>
      %c0_18 = arith.constant 0 : index
      %c0_19 = arith.constant 0 : index
      %23 = vector.load %arg7[%c0_18, %c0_19] : memref<32x32xbf16, #tpu.memory_space<vmem>>, vector<32x32xbf16>
      %cst_20 = arith.constant dense<0.000000e+00> : vector<128x32xf32>
      %24 = tpu.matmul %22, %23, %cst_20 {dimension_numbers = #tpu.dot_dimension_numbers<[1], [0], [0], [1], [0, 0, 1, 1], [], []>} : vector<128x32xbf16>, vector<32x32xbf16>, vector<128x32xf32> -> vector<128x32xf32>
      %c0_21 = arith.constant 0 : index
      %c0_22 = arith.constant 0 : index
      %25 = vector.load %arg8[%c0_21, %c0_22] : memref<1x32xf32, #tpu.memory_space<vmem>>, vector<1x32xf32>
      %26 = vector.broadcast %25 : vector<1x32xf32> to vector<128x32xf32>
      %27 = arith.addf %24, %26 : vector<128x32xf32>
      %cst_23 = arith.constant 0.000000e+00 : f32
      %28 = vector.broadcast %cst_23 : f32 to vector<128x32xf32>
      %29 = arith.maximumf %27, %28 : vector<128x32xf32>
      %30 = arith.truncf %29 : vector<128x32xf32> to vector<128x32xbf16>
      %c0_24 = arith.constant 0 : index
      %c0_25 = arith.constant 0 : index
      %31 = vector.load %arg9[%c0_24, %c0_25] : memref<128x32xbf16, #tpu.memory_space<vmem>>, vector<128x32xbf16>
      tpu.vector_store %arg9[%c0_24, %c0_25], %30 {strides = array<i32>} : memref<128x32xbf16, #tpu.memory_space<vmem>>, vector<128x32xbf16>,
      %c0_26 = arith.constant 0 : index
      %c0_27 = arith.constant 0 : index
      %32 = vector.load %arg4[%c0_26, %c0_27] : memref<128x1xf32, #tpu.memory_space<vmem>>, vector<128x1xf32>
      %33 = vector.broadcast %32 : vector<128x1xf32> to vector<128x32xf32>
      %34 = arith.mulf %29, %33 : vector<128x32xf32>
      %cst_28 = arith.constant dense<0.000000e+00> : vector<32xf32>
      %35 = vector.multi_reduction <add>, %34, %cst_28 [0] : vector<128x32xf32> to vector<32xf32>
      %36 = vector.shape_cast %35 : vector<32xf32> to vector<1x32xf32>
      %37 = vector.shape_cast %36 : vector<1x32xf32> to vector<1x1x32xf32>
      %c0_29 = arith.constant 0 : index
      %c0_30 = arith.constant 0 : index
      %c0_31 = arith.constant 0 : index
      %38 = vector.load %arg10[%c0_29, %c0_30, %c0_31] : memref<1x1x32xf32, #tpu.memory_space<vmem>>, vector<1x1x32xf32>
      tpu.vector_store %arg10[%c0_29, %c0_30, %c0_31], %37 {strides = array<i32>} : memref<1x1x32xf32, #tpu.memory_space<vmem>>, vector<1x1x32xf32>,
      %39 = arith.mulf %34, %34 : vector<128x32xf32>
      %cst_32 = arith.constant dense<0.000000e+00> : vector<32xf32>
      %40 = vector.multi_reduction <add>, %39, %cst_32 [0] : vector<128x32xf32> to vector<32xf32>
      %41 = vector.shape_cast %40 : vector<32xf32> to vector<1x32xf32>
      %42 = vector.shape_cast %41 : vector<1x32xf32> to vector<1x1x32xf32>
      %c0_33 = arith.constant 0 : index
      %c0_34 = arith.constant 0 : index
      %c0_35 = arith.constant 0 : index
      %43 = vector.load %arg11[%c0_33, %c0_34, %c0_35] : memref<1x1x32xf32, #tpu.memory_space<vmem>>, vector<1x1x32xf32>
      tpu.vector_store %arg11[%c0_33, %c0_34, %c0_35], %42 {strides = array<i32>} : memref<1x1x32xf32, #tpu.memory_space<vmem>>, vector<1x1x32xf32>,
    } else {
    }
    return
  }
  func.func @transform_0(%arg0: i32, %arg1: i32) -> (i32, i32) {
    %c0_i32 = arith.constant 0 : i32
    return %arg0, %arg1 : i32, i32
  }
  func.func @transform_1(%arg0: i32, %arg1: i32) -> (i32, i32) {
    %c0_i32 = arith.constant 0 : i32
    %c0_i32_0 = arith.constant 0 : i32
    return %arg1, %c0_i32 : i32, i32
  }
  func.func @transform_2(%arg0: i32, %arg1: i32) -> (i32, i32) {
    %c0_i32 = arith.constant 0 : i32
    %c0_i32_0 = arith.constant 0 : i32
    return %arg0, %c0_i32 : i32, i32
  }
  func.func @transform_3(%arg0: i32, %arg1: i32) -> (i32, i32) {
    %c0_i32 = arith.constant 0 : i32
    %c0_i32_0 = arith.constant 0 : i32
    %c0_i32_1 = arith.constant 0 : i32
    return %c0_i32, %c0_i32_0 : i32, i32
  }
  func.func @transform_4(%arg0: i32, %arg1: i32) -> (i32, i32) {
    %c0_i32 = arith.constant 0 : i32
    %c0_i32_0 = arith.constant 0 : i32
    %c0_i32_1 = arith.constant 0 : i32
    return %c0_i32, %c0_i32_0 : i32, i32
  }
  func.func @transform_5(%arg0: i32, %arg1: i32) -> (i32, i32) {
    %c0_i32 = arith.constant 0 : i32
    %c0_i32_0 = arith.constant 0 : i32
    %c0_i32_1 = arith.constant 0 : i32
    return %c0_i32, %c0_i32_0 : i32, i32
  }
  func.func @transform_6(%arg0: i32, %arg1: i32) -> (i32, i32) {
    %c0_i32 = arith.constant 0 : i32
    %c0_i32_0 = arith.constant 0 : i32
    %c0_i32_1 = arith.constant 0 : i32
    return %c0_i32, %c0_i32_0 : i32, i32
  }
  func.func @transform_7(%arg0: i32, %arg1: i32) -> (i32, i32) {
    %c0_i32 = arith.constant 0 : i32
    %c0_i32_0 = arith.constant 0 : i32
    return %arg0, %c0_i32 : i32, i32
  }
  func.func @transform_8(%arg0: i32, %arg1: i32) -> (i32, i32, i32) {
    %c0_i32 = arith.constant 0 : i32
    %c0_i32_0 = arith.constant 0 : i32
    %c0_i32_1 = arith.constant 0 : i32
    return %arg0, %c0_i32, %c0_i32_0 : i32, i32, i32
  }
  func.func @transform_9(%arg0: i32, %arg1: i32) -> (i32, i32, i32) {
    %c0_i32 = arith.constant 0 : i32
    %c0_i32_0 = arith.constant 0 : i32
    %c0_i32_1 = arith.constant 0 : i32
    return %arg0, %c0_i32, %c0_i32_0 : i32, i32, i32
  }
}

</mosaic_0001>

<bundles_post_ra>
// kernel: tpu_custom_call.1
= control target key start
LH: loop header
LB: loop body
LE: loop exit
PB: predicated region body
PF: predicated region fallthrough
CT: control target
= control target key end

     0   :  { %15 = vsyncpa [#allocation4], 0  ;;  %vm36_vm0 = vcmask 31744   ;;  %v1168_v2 = vmov 0.0   ;;  %s1520_s0 = inlined_call_operand.vmem [shape: s8[128,128], index: 0, kind: input, shape index: {}]   ;;  %s1521_s1 = inlined_call_operand.vmem [shape: bf16[128,4], index: 1, kind: input, shape index: {}]   ;;  %s1522_s2 = inlined_call_operand.vmem [shape: f32[128,1], index: 2, kind: input, shape index: {}]   ;;  %s1523_s3 = inlined_call_operand.vmem [shape: bf16[4,32], index: 3, kind: input, shape index: {}]   ;;  %s1524_s4 = inlined_call_operand.vmem [shape: f32[1,32], index: 4, kind: input, shape index: {}]   ;;  %s1525_s5 = inlined_call_operand.vmem [shape: bf16[32,32], index: 5, kind: input, shape index: {}]   ;;  %s1526_s6 = inlined_call_operand.vmem [shape: f32[1,32], index: 6, kind: input, shape index: {}]   ;;  %s1527_s7 = inlined_call_operand.vmem [shape: bf16[128,32], index: 7, kind: output, shape index: {0}]   ;;  %s1528_s8 = inlined_call_operand.hbm [shape: f32[1,1,32], index: 8, kind: output, shape index: {1}]   ;;  %s1529_s9 = inlined_call_operand.hbm [shape: f32[1,1,32], index: 9, kind: output, shape index: {2}]  }
   0x1   :  { %v1110_v0 = vld [vmem:[%s1521_s1] sm:$0xff]   ;;  %v1111_v1 = vld [vmem:[%s1521_s1 + $0x8] sm:$0xff]   ;;  %39 = vst.msk [vmem:[#allocation2 + $0x10] sm:$0xff] %vm36_vm0, %v1168_v2  ;;  %37 = vst.msk [vmem:[#allocation2] sm:$0xff] %vm36_vm0, %v1168_v2 }
   0x2   :  { %1033 = vmatprep.subr.bf16.mxu0 %v1110_v0  ;;  %38 = vst.msk [vmem:[#allocation2 + $0x8] sm:$0xff] %vm36_vm0, %v1168_v2  ;;  %40 = vst.msk [vmem:[#allocation2 + $0x18] sm:$0xff] %vm36_vm0, %v1168_v2  ;;  %v1112_v3 = vld [vmem:[%s1521_s1 + $0x10] sm:$0xff]   ;;  %v1113_v4 = vld [vmem:[%s1521_s1 + $0x18] sm:$0xff]  }
   0x3   :  { %41 = vst.msk [vmem:[#allocation2 + $0x20] sm:$0xff] %vm36_vm0, %v1168_v2  ;;  %42 = vst.msk [vmem:[#allocation2 + $0x28] sm:$0xff] %vm36_vm0, %v1168_v2  ;;  %1034 = vmatpush3.bf16.msra.mxu0 %v1110_v0  ;;  %v69_v5 = vld [vmem:[%s1520_s0] sm:$0xff] }
   0x4   :  { %43 = vst.msk [vmem:[#allocation2 + $0x30] sm:$0xff] %vm36_vm0, %v1168_v2  ;;  %44 = vst.msk [vmem:[#allocation2 + $0x38] sm:$0xff] %vm36_vm0, %v1168_v2  ;;  %1035 = vmatprep.subr.bf16.mxu0 %v1111_v1  ;;  %v73_v6 = vunpack.c.l.s8.bf16 %v69_v5 }
   0x5   :  { %45 = vst.msk [vmem:[#allocation2 + $0x40] sm:$0xff] %vm36_vm0, %v1168_v2  ;;  %46 = vst.msk [vmem:[#allocation2 + $0x48] sm:$0xff] %vm36_vm0, %v1168_v2 }
   0x6   :  { %47 = vst.msk [vmem:[#allocation2 + $0x50] sm:$0xff] %vm36_vm0, %v1168_v2  ;;  %48 = vst.msk [vmem:[#allocation2 + $0x58] sm:$0xff] %vm36_vm0, %v1168_v2  ;;  %1049 = vmatprep.mubr.bf16.mxu0 %v73_v6 }
   0x7   :  { %49 = vst.msk [vmem:[#allocation2 + $0x60] sm:$0xff] %vm36_vm0, %v1168_v2  ;;  %50 = vst.msk [vmem:[#allocation2 + $0x68] sm:$0xff] %vm36_vm0, %v1168_v2  ;;  %1036 = vmatpush3.bf16.msra.mxu0 %v1111_v1 }
   0x8   :  { %51 = vst.msk [vmem:[#allocation2 + $0x70] sm:$0xff] %vm36_vm0, %v1168_v2  ;;  %52 = vst.msk [vmem:[#allocation2 + $0x78] sm:$0xff] %vm36_vm0, %v1168_v2  ;;  %1037 = vmatprep.subr.bf16.mxu0 %v1112_v3 }
   0xb   :  { %1038 = vmatpush3.bf16.msra.mxu0 %v1112_v3 }
   0xc   :  { %16 = vsyncpa [#allocation6], 0  ;;  %1039 = vmatprep.subr.bf16.mxu0 %v1113_v4  ;;  %v1114_v7 = vld [vmem:[%s1521_s1 + $0x20] sm:$0xff]   ;;  %v1115_v8 = vld [vmem:[%s1521_s1 + $0x28] sm:$0xff]   ;;  %v74_v12 = vunpack.c.h.s8.bf16 %v69_v5  ;;  %vm334_vm1 = vcmask 1041408   ;;  %vm482_vm2 = vcmask 261120  }
   0xd   :  { %v1116_v9 = vld [vmem:[%s1521_s1 + $0x30] sm:$0xff]   ;;  %v1117_v10 = vld [vmem:[%s1521_s1 + $0x38] sm:$0xff]   ;;  %v70_v11 = vld [vmem:[%s1520_s0 + $0x8] sm:$0xff]  ;;  %vm684_vm3 = vcmask 257024   ;;  %vm850_vm4 = vcmask 253952   ;;  %s1171_s27 = smov [#allocation5]  }
   0xe   :  { %v75_v13 = vunpack.c.l.s8.bf16 %v70_v11  ;;  %v71_v14 = vld [vmem:[%s1520_s0 + $0x10] sm:$0xff]  ;;  %v76_v15 = vunpack.c.h.s8.bf16 %v70_v11  ;;  %v72_v17 = vld [vmem:[%s1520_s0 + $0x18] sm:$0xff]  ;;  %v302_v21 = vld [vmem:[%s1523_s3] sm:$0x3]  ;;  %s924_s28 = sshll.u32 %s1171_s27, 4  ;;  %s1487_s28 = int_to_ptr.vmem [resolvable:$true] %s924_s28 }
   0xf   :  { %1040 = vmatpush3.bf16.msra.mxu0 %v1113_v4  ;;  %v77_v16 = vunpack.c.l.s8.bf16 %v71_v14  ;;  %v78_v18 = vunpack.c.h.s8.bf16 %v71_v14  ;;  %v79_v19 = vunpack.c.l.s8.bf16 %v72_v17  ;;  %v80_v20 = vunpack.c.h.s8.bf16 %v72_v17  ;;  %1103 = vmatprep.subr.msk.bf16.mxu1 %vm334_vm1, %v302_v21  ;;  %v1118_v23 = vld [vmem:[%s1525_s5] sm:$0xff]   ;;  %v55_v24 = vld [vmem:[#allocation2 + $0x10] sm:$0xff]  ;;  %v56_v27 = vld [vmem:[#allocation2 + $0x18] sm:$0xff] }
  0x10   :  { %1041 = vmatprep.subr.bf16.mxu0 %v1114_v7  ;;  %v336_v22 = vsel %vm334_vm1, %v302_v21, 0  ;;  %v53_v25 = vld [vmem:[#allocation2] sm:$0xff]  ;;  %v54_v30 = vld [vmem:[#allocation2 + $0x8] sm:$0xff]  ;;  %v59_v36 = vld [vmem:[#allocation2 + $0x30] sm:$0xff] }
  0x11   :  { %1066 = vmatpush3.bf16.msra.mxu1 %v336_v22  ;;  %v57_v37 = vld [vmem:[#allocation2 + $0x20] sm:$0xff]  ;;  %v60_v39 = vld [vmem:[#allocation2 + $0x38] sm:$0xff]  ;;  %v58_v42 = vld [vmem:[#allocation2 + $0x28] sm:$0xff] }
  0x12   :  { %1083 = vmatprep.subr.bf16.mxu1 %v1118_v23  ;;  %v63_v51 = vld [vmem:[#allocation2 + $0x50] sm:$0xff]  ;;  %v61_v54 = vld [vmem:[#allocation2 + $0x40] sm:$0xff]  ;;  %v1119_v56 = vld [vmem:[%s1525_s5 + $0x8] sm:$0xff]  }
  0x13   :  { %1042 = vmatpush3.bf16.msra.mxu0 %v1114_v7  ;;  %v64_v58 = vld [vmem:[#allocation2 + $0x58] sm:$0xff]  ;;  %v62_v61 = vld [vmem:[#allocation2 + $0x48] sm:$0xff]  ;;  %v67_v6 = vld [vmem:[#allocation2 + $0x70] sm:$0xff] }
  0x14   :  { %1043 = vmatprep.subr.bf16.mxu0 %v1115_v8 }
  0x17   :  { %1044 = vmatpush3.bf16.msra.mxu0 %v1115_v8 }
  0x18   :  { %1045 = vmatprep.subr.bf16.mxu0 %v1116_v9 }
  0x1b   :  { %1046 = vmatpush3.bf16.msra.mxu0 %v1116_v9  ;;  %v65_v9 = vld [vmem:[#allocation2 + $0x60] sm:$0xff] }
  0x1c   :  { %1047 = vmatprep.subr.bf16.mxu0 %v1117_v10 }
  0x1f   :  { %1048 = vmatpush3.bf16.msra.mxu0 %v1117_v10 }
  0x22   :  { %1050 = vmatmul.mubr.bf16.vlgmr.msra.gmra.mrb[0].mxu0 %v74_v12  ;;  %v68_v12 = vld [vmem:[#allocation2 + $0x78] sm:$0xff] }
  0x23   :  { %1053 = vmatprep.mubr.bf16.mxu0 %v75_v13 }
  0x2a   :  { %1054 = vmatmul.mubr.bf16.gmra.mrb[4].mxu0 %v76_v15  ;;  %v66_v15 = vld [vmem:[#allocation2 + $0x68] sm:$0xff] }
  0x2b   :  { %1057 = vmatprep.mubr.bf16.mxu0 %v77_v16 }
  0x32   :  { %1058 = vmatmul.mubr.bf16.gmra.mrb[8].mxu0 %v78_v18 }
  0x33   :  { %1061 = vmatprep.mubr.bf16.mxu0 %v79_v19 }
  0x3a   :  { %1062 = vmatmul.mubr.bf16.gmra.mrb[12].mxu0 %v80_v20 }
  0xf5   :  { %v1051_v26 = vpop.f32.mrb[0].mxu0 }
  0xf6   :  { %v244_v28 = vadd.f32 %v1051_v26, %v55_v24  ;;  %v179_v29 = vpop.f32.mrb[1].mxu0 }
  0xf7   :  { %v242_v31 = vadd.f32 %v179_v29, %v53_v25  ;;  %v1052_v32 = vpop.f32.mrb[2].mxu0 }
  0xf8   :  { %261 = vst.msk [vmem:[#allocation2 + $0x10] sm:$0xff] %vm36_vm0, %v244_v28  ;;  %v245_v33 = vadd.f32 %v1052_v32, %v56_v27  ;;  %v182_v34 = vpop.f32.mrb[3].mxu0 }
  0xf9   :  { %259 = vst.msk [vmem:[#allocation2] sm:$0xff] %vm36_vm0, %v242_v31  ;;  %v243_v35 = vadd.f32 %v182_v34, %v54_v30  ;;  %v703_v34 = vld [vmem:[%s1522_s2 + $0x10] sm:$0xff] }
  0xfa   :  { %262 = vst.msk [vmem:[#allocation2 + $0x18] sm:$0xff] %vm36_vm0, %v245_v33  ;;  %v701_v33 = vld [vmem:[%s1522_s2] sm:$0xff] }
  0xfb   :  { %260 = vst.msk [vmem:[#allocation2 + $0x8] sm:$0xff] %vm36_vm0, %v243_v35  ;;  %v1169_v35 = vmov 0  }
  0xfc   :  { %1108 = vset.pattern.permute.xlu0 %v1169_v35  ;;  %1109 = vset.pattern.permute.xlu1 %v1169_v35 }
  0xfd   :  { %v1055_v38 = vpop.f32.mrb[4].mxu0  ;;  %719 = vperm.xlu0 %1108, %v701_v33   ;;  %729 = vperm.xlu1 %1109, %v703_v34  }
  0xfe   :  { %v248_v40 = vadd.f32 %v1055_v38, %v59_v36  ;;  %v195_v41 = vpop.f32.mrb[5].mxu0  ;;  %v702_v36 = vld [vmem:[%s1522_s2 + $0x8] sm:$0xff]  ;;  %v705_v38 = vld [vmem:[%s1522_s2 + $0x20] sm:$0xff] }
  0xff   :  { %v246_v43 = vadd.f32 %v195_v41, %v57_v37  ;;  %v1056_v44 = vpop.f32.mrb[6].mxu0  ;;  %v280_v53 = vld [vmem:[#allocation2 + $0x10] sm:$0xff]  ;;  %v704_v37 = vld [vmem:[%s1522_s2 + $0x18] sm:$0xff] }
 0x100   :  { %265 = vst.msk [vmem:[#allocation2 + $0x30] sm:$0xff] %vm36_vm0, %v248_v40  ;;  %v249_v45 = vadd.f32 %v1056_v44, %v60_v39  ;;  %v198_v46 = vpop.f32.mrb[7].mxu0  ;;  %v278_v49 = vld [vmem:[#allocation2] sm:$0xff]  ;;  %v706_v39 = vld [vmem:[%s1522_s2 + $0x28] sm:$0xff]  ;;  %v707_v40 = vld [vmem:[%s1522_s2 + $0x30] sm:$0xff] }
 0x101   :  { %263 = vst.msk [vmem:[#allocation2 + $0x20] sm:$0xff] %vm36_vm0, %v246_v43  ;;  %v247_v47 = vadd.f32 %v198_v46, %v58_v42  ;;  %v281_v48 = vld [vmem:[#allocation2 + $0x18] sm:$0xff]  ;;  %724 = vperm.xlu0 %1108, %v702_v36   ;;  %734 = vperm.xlu1 %1109, %v704_v37   ;;  %v709_v42 = vld [vmem:[%s1522_s2 + $0x40] sm:$0xff]  ;;  %v710_v43 = vld [vmem:[%s1522_s2 + $0x48] sm:$0xff] }
 0x102   :  { %266 = vst.msk [vmem:[#allocation2 + $0x38] sm:$0xff] %vm36_vm0, %v249_v45  ;;  %v279_v50 = vld [vmem:[#allocation2 + $0x8] sm:$0xff]  ;;  %v295_v55 = vpack.c.bf16 %v281_v48, %v280_v53  ;;  %v708_v41 = vld [vmem:[%s1522_s2 + $0x38] sm:$0xff]  ;;  %v711_v44 = vld [vmem:[%s1522_s2 + $0x50] sm:$0xff] }
 0x103   :  { %264 = vst.msk [vmem:[#allocation2 + $0x28] sm:$0xff] %vm36_vm0, %v247_v47  ;;  %v294_v52 = vpack.c.bf16 %v279_v50, %v278_v49  ;;  %v712_v45 = vld [vmem:[%s1522_s2 + $0x58] sm:$0xff]  ;;  %v713_v46 = vld [vmem:[%s1522_s2 + $0x60] sm:$0xff]  ;;  %v714_v47 = vld [vmem:[%s1522_s2 + $0x68] sm:$0xff] }
 0x104   :  { %v715_v48 = vld [vmem:[%s1522_s2 + $0x70] sm:$0xff]  ;;  %v716_v49 = vld [vmem:[%s1522_s2 + $0x78] sm:$0xff]  ;;  %v946_v50 = vld [vmem:[%s1524_s4] ss:$0 sm:$0xff] }
 0x105   :  { %v1059_v57 = vpop.f32.mrb[8].mxu0  ;;  %1067 = vmatprep.mubr.msk.bf16.mxu1 %vm36_vm0, %v294_v52  ;;  %739 = vperm.xlu0 %1108, %v705_v38  }
 0x106   :  { %v252_v59 = vadd.f32 %v1059_v57, %v63_v51  ;;  %v211_v60 = vpop.f32.mrb[9].mxu0  ;;  %1068 = vmatmul.mubr.msk.bf16.vlgmr.msra.gmra.mrb[0].mxu1 %vm36_vm0, %v295_v55  ;;  %744 = vperm.xlu1 %1109, %v706_v39  }
 0x107   :  { %v250_v62 = vadd.f32 %v211_v60, %v61_v54  ;;  %v1060_v63 = vpop.f32.mrb[10].mxu0  ;;  %1084 = vmatpush3.bf16.msra.mxu1 %v1118_v23  ;;  %v284_v8 = vld [vmem:[#allocation2 + $0x30] sm:$0xff] }
 0x108   :  { %269 = vst.msk [vmem:[#allocation2 + $0x50] sm:$0xff] %vm36_vm0, %v252_v59  ;;  %v253_v0 = vadd.f32 %v1060_v63, %v64_v58  ;;  %v214_v1 = vpop.f32.mrb[11].mxu0  ;;  %1085 = vmatprep.subr.bf16.mxu1 %v1119_v56  ;;  %v282_v4 = vld [vmem:[#allocation2 + $0x20] sm:$0xff] }
 0x109   :  { %267 = vst.msk [vmem:[#allocation2 + $0x40] sm:$0xff] %vm36_vm0, %v250_v62  ;;  %v251_v2 = vadd.f32 %v214_v1, %v62_v61  ;;  %v285_v3 = vld [vmem:[#allocation2 + $0x38] sm:$0xff]  ;;  %749 = vperm.xlu0 %1108, %v707_v40  }
 0x10a   :  { %270 = vst.msk [vmem:[#allocation2 + $0x58] sm:$0xff] %vm36_vm0, %v253_v0  ;;  %v283_v5 = vld [vmem:[#allocation2 + $0x28] sm:$0xff]  ;;  %v297_v10 = vpack.c.bf16 %v285_v3, %v284_v8  ;;  %754 = vperm.xlu1 %1109, %v708_v41  }
 0x10b   :  { %268 = vst.msk [vmem:[#allocation2 + $0x48] sm:$0xff] %vm36_vm0, %v251_v2  ;;  %v296_v7 = vpack.c.bf16 %v283_v5, %v282_v4  ;;  %1086 = vmatpush3.bf16.msra.mxu1 %v1119_v56 }
 0x10d   :  { %v1063_v11 = vpop.f32.mrb[12].mxu0  ;;  %1071 = vmatprep.mubr.msk.bf16.mxu1 %vm36_vm0, %v296_v7  ;;  %759 = vperm.xlu0 %1108, %v709_v42  }
 0x10e   :  { %v256_v13 = vadd.f32 %v1063_v11, %v67_v6  ;;  %v227_v14 = vpop.f32.mrb[13].mxu0  ;;  %1072 = vmatmul.mubr.msk.bf16.gmra.mrb[4].mxu1 %vm36_vm0, %v297_v10  ;;  %764 = vperm.xlu1 %1109, %v710_v43  }
 0x10f   :  { %v254_v16 = vadd.f32 %v227_v14, %v65_v9  ;;  %v1064_v17 = vpop.f32.mrb[14].mxu0  ;;  %v288_v25 = vld [vmem:[#allocation2 + $0x50] sm:$0xff] }
 0x110   :  { %273 = vst.msk [vmem:[#allocation2 + $0x70] sm:$0xff] %vm36_vm0, %v256_v13  ;;  %v257_v18 = vadd.f32 %v1064_v17, %v68_v12  ;;  %v230_v19 = vpop.f32.mrb[15].mxu0  ;;  %v286_v22 = vld [vmem:[#allocation2 + $0x40] sm:$0xff] }
 0x111   :  { %271 = vst.msk [vmem:[#allocation2 + $0x60] sm:$0xff] %vm36_vm0, %v254_v16  ;;  %v255_v20 = vadd.f32 %v230_v19, %v66_v15  ;;  %v289_v21 = vld [vmem:[#allocation2 + $0x58] sm:$0xff]  ;;  %769 = vperm.xlu0 %1108, %v711_v44  }
 0x112   :  { %274 = vst.msk [vmem:[#allocation2 + $0x78] sm:$0xff] %vm36_vm0, %v257_v18  ;;  %v287_v23 = vld [vmem:[#allocation2 + $0x48] sm:$0xff]  ;;  %v299_v26 = vpack.c.bf16 %v289_v21, %v288_v25  ;;  %774 = vperm.xlu1 %1109, %v712_v45  }
 0x113   :  { %272 = vst.msk [vmem:[#allocation2 + $0x68] sm:$0xff] %vm36_vm0, %v255_v20  ;;  %v298_v24 = vpack.c.bf16 %v287_v23, %v286_v22 }
 0x115   :  { %1075 = vmatprep.mubr.msk.bf16.mxu1 %vm36_vm0, %v298_v24  ;;  %779 = vperm.xlu0 %1108, %v713_v46   ;;  %v1369_v46 = vld [vmem:[%s1526_s6] ss:$0 sm:$0xff] }
 0x116   :  { %1076 = vmatmul.mubr.msk.bf16.gmra.mrb[8].mxu1 %vm36_vm0, %v299_v26  ;;  %784 = vperm.xlu1 %1109, %v714_v47  }
 0x117   :  { %v292_v31 = vld [vmem:[#allocation2 + $0x70] sm:$0xff] }
 0x118   :  { %v290_v28 = vld [vmem:[#allocation2 + $0x60] sm:$0xff] }
 0x119   :  { %v293_v27 = vld [vmem:[#allocation2 + $0x78] sm:$0xff]  ;;  %789 = vperm.xlu0 %1108, %v715_v48  }
 0x11a   :  { %v291_v29 = vld [vmem:[#allocation2 + $0x68] sm:$0xff]  ;;  %v301_v32 = vpack.c.bf16 %v293_v27, %v292_v31  ;;  %794 = vperm.xlu1 %1109, %v716_v49  }
 0x11b   :  { %v300_v30 = vpack.c.bf16 %v291_v29, %v290_v28 }
 0x11d   :  { %1079 = vmatprep.mubr.msk.bf16.mxu1 %vm36_vm0, %v300_v30 }
 0x11e   :  { %1080 = vmatmul.mubr.msk.bf16.gmra.mrb[12].mxu1 %vm36_vm0, %v301_v32 }
 0x17c   :  { %v720_v43 = vpop.permute.xlu0 %719  ;;  %v730_v44 = vpop.permute.xlu1 %729 }
 0x180   :  { %v725_v45 = vpop.permute.xlu0 %724  ;;  %v735_v47 = vpop.permute.xlu1 %734 }
 0x1d9   :  { %v1069_v51 = vpop.f32.mrb[0].mxu1 }
 0x1da   :  { %v381_v52 = vadd.f32 %v1069_v51, %v946_v50  ;;  %v372_v53 = vpop.f32.mrb[1].mxu1 }
 0x1db   :  { %v373_v54 = vadd.f32 %v946_v50, %v372_v53  ;;  %v1070_v55 = vpop.f32.mrb[2].mxu1  ;;  %v740_v53 = vpop.permute.xlu0 %739 }
 0x1dc   :  { %v384_v56 = vadd.f32 %v1070_v55, %v946_v50  ;;  %v375_v57 = vpop.f32.mrb[3].mxu1  ;;  %v437_v59 = vmax.f32 %v381_v52, 0.0 }
 0x1dd   :  { %v376_v58 = vadd.f32 %v946_v50, %v375_v57  ;;  %v435_v61 = vmax.f32 %v373_v54, 0.0 }
 0x1de   :  { %v438_v60 = vmax.f32 %v384_v56, 0.0 }
 0x1df   :  { %v436_v62 = vmax.f32 %v376_v58, 0.0 }
 0x1e0   :  { %v452_v63 = vpack.c.bf16 %v438_v60, %v437_v59  ;;  %v1375_v59 = vpop.permute.xlu1 %744 }
 0x1e1   :  { %v451_v0 = vpack.c.bf16 %v436_v62, %v435_v61  ;;  %v1073_v1 = vpop.f32.mrb[4].mxu1 }
 0x1e2   :  { %v397_v2 = vadd.f32 %v1073_v1, %v946_v50  ;;  %v388_v3 = vpop.f32.mrb[5].mxu1 }
 0x1e3   :  { %v389_v4 = vadd.f32 %v946_v50, %v388_v3  ;;  %v1074_v5 = vpop.f32.mrb[6].mxu1  ;;  %1087 = vmatprep.mubr.msk.bf16.mxu1 %vm482_vm2, %v451_v0 }
 0x1e4   :  { %v400_v6 = vadd.f32 %v1074_v5, %v946_v50  ;;  %v391_v7 = vpop.f32.mrb[7].mxu1  ;;  %1088 = vmatmul.mubr.msk.bf16.vlgmr.msra.gmra.mrb[16].mxu1 %vm482_vm2, %v452_v63  ;;  %v441_v9 = vmax.f32 %v397_v2, 0.0 }
 0x1e5   :  { %v392_v8 = vadd.f32 %v946_v50, %v391_v7  ;;  %v439_v11 = vmax.f32 %v389_v4, 0.0 }
 0x1e6   :  { %v442_v10 = vmax.f32 %v400_v6, 0.0 }
 0x1e7   :  { %v440_v12 = vmax.f32 %v392_v8, 0.0 }
 0x1e8   :  { %v454_v13 = vpack.c.bf16 %v442_v10, %v441_v9  ;;  %v750_v9 = vpop.permute.xlu0 %749 }
 0x1e9   :  { %v453_v14 = vpack.c.bf16 %v440_v12, %v439_v11  ;;  %v1077_v15 = vpop.f32.mrb[8].mxu1 }
 0x1ea   :  { %v413_v16 = vadd.f32 %v1077_v15, %v946_v50  ;;  %v404_v17 = vpop.f32.mrb[9].mxu1 }
 0x1eb   :  { %v405_v18 = vadd.f32 %v946_v50, %v404_v17  ;;  %v1078_v19 = vpop.f32.mrb[10].mxu1  ;;  %1091 = vmatprep.mubr.msk.bf16.mxu1 %vm482_vm2, %v453_v14 }
 0x1ec   :  { %v416_v20 = vadd.f32 %v1078_v19, %v946_v50  ;;  %v407_v21 = vpop.f32.mrb[11].mxu1  ;;  %1092 = vmatmul.mubr.msk.bf16.gmra.mrb[20].mxu1 %vm482_vm2, %v454_v13  ;;  %v445_v23 = vmax.f32 %v413_v16, 0.0 }
 0x1ed   :  { %v408_v22 = vadd.f32 %v946_v50, %v407_v21  ;;  %v443_v25 = vmax.f32 %v405_v18, 0.0 }
 0x1ee   :  { %v446_v24 = vmax.f32 %v416_v20, 0.0  ;;  %v755_v20 = vpop.permute.xlu1 %754 }
 0x1ef   :  { %v444_v26 = vmax.f32 %v408_v22, 0.0 }
 0x1f0   :  { %v456_v27 = vpack.c.bf16 %v446_v24, %v445_v23 }
 0x1f1   :  { %v455_v28 = vpack.c.bf16 %v444_v26, %v443_v25  ;;  %v1081_v29 = vpop.f32.mrb[12].mxu1 }
 0x1f2   :  { %v429_v30 = vadd.f32 %v1081_v29, %v946_v50  ;;  %v420_v31 = vpop.f32.mrb[13].mxu1 }
 0x1f3   :  { %v421_v32 = vadd.f32 %v946_v50, %v420_v31  ;;  %v1082_v33 = vpop.f32.mrb[14].mxu1  ;;  %1095 = vmatprep.mubr.msk.bf16.mxu1 %vm482_vm2, %v455_v28 }
 0x1f4   :  { %v432_v34 = vadd.f32 %v1082_v33, %v946_v50  ;;  %v423_v35 = vpop.f32.mrb[15].mxu1  ;;  %1096 = vmatmul.mubr.msk.bf16.gmra.mrb[24].mxu1 %vm482_vm2, %v456_v27  ;;  %v449_v37 = vmax.f32 %v429_v30, 0.0 }
 0x1f5   :  { %v424_v36 = vadd.f32 %v946_v50, %v423_v35  ;;  %v447_v39 = vmax.f32 %v421_v32, 0.0 }
 0x1f6   :  { %v450_v38 = vmax.f32 %v432_v34, 0.0 }
 0x1f7   :  { %v448_v40 = vmax.f32 %v424_v36, 0.0 }
 0x1f8   :  { %v458_v41 = vpack.c.bf16 %v450_v38, %v449_v37  ;;  %v760_v38 = vpop.permute.xlu0 %759 }
 0x1f9   :  { %v457_v42 = vpack.c.bf16 %v448_v40, %v447_v39 }
 0x1fb   :  { %1099 = vmatprep.mubr.msk.bf16.mxu1 %vm482_vm2, %v457_v42 }
 0x1fc   :  { %1100 = vmatmul.mubr.msk.bf16.gmra.mrb[28].mxu1 %vm482_vm2, %v458_v41 }
 0x2b7   :  { %v1089_v48 = vpop.f32.mrb[16].mxu1 }
 0x2b8   :  { %v550_v49 = vadd.f32 %v1089_v48, %v1369_v46  ;;  %v541_v50 = vpop.f32.mrb[17].mxu1 }
 0x2b9   :  { %v542_v51 = vadd.f32 %v1369_v46, %v541_v50  ;;  %v1090_v52 = vpop.f32.mrb[18].mxu1 }
 0x2ba   :  { %v606_v54 = vmax.f32 %v550_v49, 0.0  ;;  %v553_v55 = vadd.f32 %v1090_v52, %v1369_v46  ;;  %v544_v56 = vpop.f32.mrb[19].mxu1 }
 0x2bb   :  { %v604_v57 = vmax.f32 %v542_v51, 0.0  ;;  %v545_v58 = vadd.f32 %v1369_v46, %v544_v56 }
 0x2bc   :  { %v984_v60 = vpack.c.bf16 %v606_v54, %v606_v54  ;;  %v799_v61 = vmul.f32 %v730_v44, %v606_v54  ;;  %v607_v62 = vmax.f32 %v553_v55, 0.0 }
 0x2bd   :  { %v982_v63 = vpack.c.bf16 %v604_v57, %v604_v57  ;;  %v797_v0 = vmul.f32 %v720_v43, %v604_v57  ;;  %v605_v1 = vmax.f32 %v545_v58, 0.0 }
 0x2be   :  { %687 = vst.msk [vmem:[%s1527_s7 + $0x8] sm:$0xf] %vm684_vm3, %v984_v60  ;;  %v854_v2 = vmul.f32 %v799_v61, %v799_v61  ;;  %v985_v3 = vpack.c.bf16 %v607_v62, %v607_v62  ;;  %v800_v4 = vmul.f32 %v735_v47, %v607_v62  ;;  %v816_v10 = vsel %vm482_vm2, %v799_v61, 0.0  ;;  %v765_v47 = vpop.permute.xlu1 %764 }
 0x2bf   :  { %685 = vst.msk [vmem:[%s1527_s7] sm:$0xf] %vm684_vm3, %v982_v63  ;;  %v852_v5 = vmul.f32 %v797_v0, %v797_v0  ;;  %v983_v6 = vpack.c.bf16 %v605_v1, %v605_v1  ;;  %v798_v7 = vmul.f32 %v725_v45, %v605_v1  ;;  %v1093_v8 = vpop.f32.mrb[20].mxu1  ;;  %v813_v12 = vsel %vm482_vm2, %v797_v0, 0.0 }
 0x2c0   :  { %v871_v11 = vsel %vm482_vm2, %v854_v2, 0.0  ;;  %688 = vst.msk [vmem:[%s1527_s7 + $0xc] sm:$0xf] %vm684_vm3, %v985_v3  ;;  %v566_v13 = vadd.f32 %v1093_v8, %v1369_v46  ;;  %v557_v14 = vpop.f32.mrb[21].mxu1  ;;  %v818_v15 = vsel %vm482_vm2, %v800_v4, 0.0  ;;  %v855_v21 = vmul.f32 %v800_v4, %v800_v4 }
 0x2c1   :  { %686 = vst.msk [vmem:[%s1527_s7 + $0x4] sm:$0xf] %vm684_vm3, %v983_v6  ;;  %v814_v16 = vsel %vm482_vm2, %v798_v7, 0.0  ;;  %v853_v17 = vmul.f32 %v798_v7, %v798_v7  ;;  %v558_v18 = vadd.f32 %v1369_v46, %v557_v14  ;;  %v1094_v19 = vpop.f32.mrb[22].mxu1  ;;  %v868_v26 = vsel %vm482_vm2, %v852_v5, 0.0 }
 0x2c2   :  { %v815_v22 = vadd.f32 %v814_v16, %v813_v12  ;;  %v610_v23 = vmax.f32 %v566_v13, 0.0  ;;  %v569_v24 = vadd.f32 %v1094_v19, %v1369_v46  ;;  %v560_v25 = vpop.f32.mrb[23].mxu1  ;;  %v873_v41 = vsel %vm482_vm2, %v855_v21, 0.0 }
 0x2c3   :  { %v869_v27 = vsel %vm482_vm2, %v853_v17, 0.0  ;;  %v608_v28 = vmax.f32 %v558_v18, 0.0  ;;  %v561_v29 = vadd.f32 %v1369_v46, %v560_v25 }
 0x2c4   :  { %v817_v30 = vadd.f32 %v816_v10, %v815_v22  ;;  %v870_v31 = vadd.f32 %v869_v27, %v868_v26  ;;  %v988_v32 = vpack.c.bf16 %v610_v23, %v610_v23  ;;  %v803_v33 = vmul.f32 %v750_v9, %v610_v23  ;;  %v775_v10 = vpop.permute.xlu1 %774 }
 0x2c5   :  { %v986_v34 = vpack.c.bf16 %v608_v28, %v608_v28  ;;  %v801_v35 = vmul.f32 %v740_v53, %v608_v28  ;;  %v611_v36 = vmax.f32 %v569_v24, 0.0  ;;  %v609_v37 = vmax.f32 %v561_v29, 0.0 }
 0x2c6   :  { %v872_v39 = vadd.f32 %v871_v11, %v870_v31  ;;  %691 = vst.msk [vmem:[%s1527_s7 + $0x18] sm:$0xf] %vm684_vm3, %v988_v32  ;;  %v819_v40 = vadd.f32 %v818_v15, %v817_v30  ;;  %v858_v52 = vmul.f32 %v803_v33, %v803_v33  ;;  %v824_v6 = vsel %vm482_vm2, %v803_v33, 0.0 }
 0x2c7   :  { %689 = vst.msk [vmem:[%s1527_s7 + $0x10] sm:$0xf] %vm684_vm3, %v986_v34  ;;  %v820_v42 = vsel %vm482_vm2, %v801_v35, 0.0  ;;  %v856_v43 = vmul.f32 %v801_v35, %v801_v35  ;;  %v989_v44 = vpack.c.bf16 %v611_v36, %v611_v36  ;;  %v1097_v45 = vpop.f32.mrb[24].mxu1  ;;  %v987_v50 = vpack.c.bf16 %v609_v37, %v609_v37 }
 0x2c8   :  { %v821_v48 = vadd.f32 %v820_v42, %v819_v40  ;;  %v874_v49 = vadd.f32 %v873_v41, %v872_v39  ;;  %v573_v51 = vpop.f32.mrb[25].mxu1  ;;  %v804_v54 = vmul.f32 %v755_v20, %v611_v36  ;;  %v802_v55 = vmul.f32 %v1375_v59, %v609_v37  ;;  %v770_v59 = vpop.permute.xlu0 %769 }
 0x2c9   :  { %v875_v53 = vsel %vm482_vm2, %v856_v43, 0.0  ;;  %692 = vst.msk [vmem:[%s1527_s7 + $0x1c] sm:$0xf] %vm684_vm3, %v989_v44  ;;  %v1098_v56 = vpop.f32.mrb[26].mxu1  ;;  %690 = vst.msk [vmem:[%s1527_s7 + $0x14] sm:$0xf] %vm684_vm3, %v987_v50  ;;  %v582_v58 = vadd.f32 %v1097_v45, %v1369_v46  ;;  %v574_v60 = vadd.f32 %v1369_v46, %v573_v51  ;;  %v785_v37 = vpop.permute.xlu1 %784 }
 0x2ca   :  { %v876_v57 = vadd.f32 %v875_v53, %v874_v49  ;;  %v585_v61 = vadd.f32 %v1098_v56, %v1369_v46  ;;  %v576_v62 = vpop.f32.mrb[27].mxu1  ;;  %v822_v63 = vsel %vm482_vm2, %v802_v55, 0.0  ;;  %v857_v0 = vmul.f32 %v802_v55, %v802_v55 }
 0x2cb   :  { %v577_v1 = vadd.f32 %v1369_v46, %v576_v62  ;;  %v823_v2 = vadd.f32 %v822_v63, %v821_v48  ;;  %v614_v3 = vmax.f32 %v582_v58, 0.0  ;;  %v612_v4 = vmax.f32 %v574_v60, 0.0 }
 0x2cc   :  { %v615_v5 = vmax.f32 %v585_v61, 0.0  ;;  %v879_v7 = vsel %vm482_vm2, %v858_v52, 0.0  ;;  %v859_v8 = vmul.f32 %v804_v54, %v804_v54  ;;  %v877_v9 = vsel %vm482_vm2, %v857_v0, 0.0  ;;  %v780_v28 = vpop.permute.xlu0 %779 }
 0x2cd   :  { %v825_v11 = vadd.f32 %v824_v6, %v823_v2  ;;  %v878_v12 = vadd.f32 %v877_v9, %v876_v57  ;;  %v992_v13 = vpack.c.bf16 %v614_v3, %v614_v3  ;;  %v613_v14 = vmax.f32 %v577_v1, 0.0  ;;  %v795_v0 = vpop.permute.xlu1 %794 }
 0x2ce   :  { %v826_v15 = vsel %vm482_vm2, %v804_v54, 0.0  ;;  %v990_v16 = vpack.c.bf16 %v612_v4, %v612_v4  ;;  %v805_v17 = vmul.f32 %v760_v38, %v612_v4  ;;  %v993_v18 = vpack.c.bf16 %v615_v5, %v615_v5 }
 0x2cf   :  { %v1101_v19 = vpop.f32.mrb[28].mxu1  ;;  %v880_v20 = vadd.f32 %v879_v7, %v878_v12  ;;  %695 = vst.msk [vmem:[%s1527_s7 + $0x28] sm:$0xf] %vm684_vm3, %v992_v13  ;;  %v827_v21 = vadd.f32 %v826_v15, %v825_v11  ;;  %v881_v23 = vsel %vm482_vm2, %v859_v8, 0.0  ;;  %v807_v24 = vmul.f32 %v770_v59, %v614_v3 }
 0x2d0   :  { %v589_v22 = vpop.f32.mrb[29].mxu1  ;;  %693 = vst.msk [vmem:[%s1527_s7 + $0x20] sm:$0xf] %vm684_vm3, %v990_v16  ;;  %v828_v25 = vsel %vm482_vm2, %v805_v17, 0.0  ;;  %v860_v26 = vmul.f32 %v805_v17, %v805_v17  ;;  %696 = vst.msk [vmem:[%s1527_s7 + $0x2c] sm:$0xf] %vm684_vm3, %v993_v18  ;;  %v991_v31 = vpack.c.bf16 %v613_v14, %v613_v14  ;;  %v808_v34 = vmul.f32 %v775_v10, %v615_v5  ;;  %v790_v55 = vpop.permute.xlu0 %789 }
 0x2d1   :  { %v1102_v27 = vpop.f32.mrb[30].mxu1  ;;  %v829_v29 = vadd.f32 %v828_v25, %v827_v21  ;;  %v882_v30 = vadd.f32 %v881_v23, %v880_v20  ;;  %v806_v35 = vmul.f32 %v765_v47, %v613_v14  ;;  %v598_v36 = vadd.f32 %v1101_v19, %v1369_v46 }
 0x2d2   :  { %v592_v32 = vpop.f32.mrb[31].mxu1  ;;  %v883_v33 = vsel %vm482_vm2, %v860_v26, 0.0  ;;  %694 = vst.msk [vmem:[%s1527_s7 + $0x24] sm:$0xf] %vm684_vm3, %v991_v31  ;;  %v590_v39 = vadd.f32 %v1369_v46, %v589_v22  ;;  %v601_v40 = vadd.f32 %v1102_v27, %v1369_v46  ;;  %v862_v42 = vmul.f32 %v807_v24, %v807_v24 }
 0x2d3   :  { %v884_v38 = vadd.f32 %v883_v33, %v882_v30  ;;  %v593_v41 = vadd.f32 %v1369_v46, %v592_v32  ;;  %v830_v43 = vsel %vm482_vm2, %v806_v35, 0.0  ;;  %v861_v44 = vmul.f32 %v806_v35, %v806_v35 }
 0x2d4   :  { %v618_v45 = vmax.f32 %v598_v36, 0.0  ;;  %v832_v47 = vsel %vm482_vm2, %v807_v24, 0.0  ;;  %v831_v48 = vadd.f32 %v830_v43, %v829_v29  ;;  %v616_v49 = vmax.f32 %v590_v39, 0.0 }
 0x2d5   :  { %v619_v50 = vmax.f32 %v601_v40, 0.0  ;;  %v863_v51 = vmul.f32 %v808_v34, %v808_v34  ;;  %v885_v52 = vsel %vm482_vm2, %v861_v44, 0.0  ;;  %v617_v54 = vmax.f32 %v593_v41, 0.0 }
 0x2d6   :  { %v996_v53 = vpack.c.bf16 %v618_v45, %v618_v45  ;;  %v833_v56 = vadd.f32 %v832_v47, %v831_v48  ;;  %v886_v57 = vadd.f32 %v885_v52, %v884_v38  ;;  %v994_v58 = vpack.c.bf16 %v616_v49, %v616_v49 }
 0x2d7   :  { %v809_v46 = vmul.f32 %v780_v28, %v616_v49  ;;  %v887_v60 = vsel %vm482_vm2, %v862_v42, 0.0  ;;  %v834_v61 = vsel %vm482_vm2, %v808_v34, 0.0  ;;  %v811_v62 = vmul.f32 %v790_v55, %v618_v45 }
 0x2d8   :  { %699 = vst.msk [vmem:[%s1527_s7 + $0x38] sm:$0xf] %vm684_vm3, %v996_v53  ;;  %v997_v63 = vpack.c.bf16 %v619_v50, %v619_v50  ;;  %v888_v1 = vadd.f32 %v887_v60, %v886_v57  ;;  %697 = vst.msk [vmem:[%s1527_s7 + $0x30] sm:$0xf] %vm684_vm3, %v994_v58  ;;  %v835_v59 = vadd.f32 %v834_v61, %v833_v56  ;;  %v889_v4 = vsel %vm482_vm2, %v863_v51, 0.0 }
 0x2d9   :  { %v836_v2 = vsel %vm482_vm2, %v809_v46, 0.0  ;;  %v864_v3 = vmul.f32 %v809_v46, %v809_v46  ;;  %v812_v5 = vmul.f32 %v795_v0, %v619_v50  ;;  %v995_v6 = vpack.c.bf16 %v617_v54, %v617_v54 }
 0x2da   :  { %700 = vst.msk [vmem:[%s1527_s7 + $0x3c] sm:$0xf] %vm684_vm3, %v997_v63  ;;  %v837_v7 = vadd.f32 %v836_v2, %v835_v59  ;;  %v890_v8 = vadd.f32 %v889_v4, %v888_v1  ;;  %v810_v10 = vmul.f32 %v785_v37, %v617_v54  ;;  %v866_v11 = vmul.f32 %v811_v62, %v811_v62 }
 0x2db   :  { %v891_v9 = vsel %vm482_vm2, %v864_v3, 0.0  ;;  %698 = vst.msk [vmem:[%s1527_s7 + $0x34] sm:$0xf] %vm684_vm3, %v995_v6  ;;  %v840_v16 = vsel %vm482_vm2, %v811_v62, 0.0  ;;  %v867_v17 = vmul.f32 %v812_v5, %v812_v5  ;;  %v842_v22 = vsel %vm482_vm2, %v812_v5, 0.0  ;;  %s1170_s7 = smov [#allocation3]  }
 0x2dc   :  { %v892_v12 = vadd.f32 %v891_v9, %v890_v8  ;;  %v838_v13 = vsel %vm482_vm2, %v810_v10, 0.0  ;;  %v865_v14 = vmul.f32 %v810_v10, %v810_v10  ;;  %v895_v21 = vsel %vm482_vm2, %v866_v11, 0.0  ;;  %s914_s26 = sshll.u32 %s1170_s7, 4  ;;  %s915_s26 = int_to_ptr.vmem [resolvable:$true] %s914_s26 }
 0x2dd   :  { %v839_v15 = vadd.f32 %v838_v13, %v837_v7  ;;  %v897_v25 = vsel %vm482_vm2, %v867_v17, 0.0  ;;  %s1120_s29 = scalar_lea.vmem %s915_s26, 16  ;;  %s1124_s30 = scalar_lea.vmem %s915_s26, 32 }
 0x2de   :  { %v893_v18 = vsel %vm482_vm2, %v865_v14, 0.0  ;;  %p1121_p0 = scmp.ne.s32.totalorder %s915_s26, %s1120_s29  ;;  %p1125_p1 = scmp.lt.s32.totalorder %s915_s26, %s915_s26 }
 0x2df   :  { %v841_v19 = vadd.f32 %v840_v16, %v839_v15  ;;  %v894_v20 = vadd.f32 %v893_v18, %v892_v12  ;;  %p1126_p2 = scmp.lt.s32.totalorder %s1124_s30, %s1120_s29 }
 0x2e1   :  { %v896_v23 = vadd.f32 %v895_v21, %v894_v20  ;;  %v843_v24 = vadd.f32 %v842_v22, %v841_v19  ;;  %p1127_p3 = por %p1126_p2, %p1125_p1 }
 0x2e3   :  { %v844_v26 = vrot.slane %v843_v24, 4  ;;  %v898_v27 = vadd.f32 %v897_v25, %v896_v23  ;;  %p1128_p4 = pnand %p1127_p3, %p1121_p0 }
 0x2e5   :  { %v845_v28 = vadd.f32 %v844_v26, %v843_v24  ;;  %v899_v29 = vrot.slane %v898_v27, 4 }
 0x2e7   :  { %v846_v30 = vrot.slane %v845_v28, 2  ;;  %v900_v31 = vadd.f32 %v899_v29, %v898_v27 }
 0x2e9   :  { %v847_v32 = vadd.f32 %v846_v30, %v845_v28  ;;  %v901_v33 = vrot.slane %v900_v31, 2 }
 0x2eb   :  { %v848_v34 = vrot.slane %v847_v32, 1  ;;  %v902_v35 = vadd.f32 %v901_v33, %v900_v31 }
 0x2ed   :  { %v849_v36 = vadd.f32 %v848_v34, %v847_v32  ;;  %v903_v37 = vrot.slane %v902_v35, 1 }
 0x2ef   :  { %851 = vst.msk [vmem:[#allocation3] sm:$0x1] %vm850_vm4, %v849_v36  ;;  %v904_v38 = vadd.f32 %v903_v37, %v902_v35 }
 0x2f0   :  { %1131 = shalt.err (!%p1128_p4)
}
 0x2f1   :  { %s1132_s11 = scalar_lea.hbm %s1528_s8, 16 }
 0x2f2   :  { %p1133_p5 = scmp.ne.s32.totalorder %s1528_s8, %s1132_s11  ;;  %p1136_p6 = scmp.lt.u32.totalorder %s1132_s11, %s1528_s8 }
 0x2f4   :  { %p1138_p7 = pnand %p1136_p6, %p1133_p5 }
 0x2f6   :  { %1141 = shalt.err (!%p1138_p7)
}
 0x2f7   :  { %917 = dma.vmem_to_hbm [thread:$0]  %s915_s26, 16, %s1528_s8, [#allocation4]   ;;  %905 = vst.msk [vmem:[#allocation5] sm:$0x1] %vm850_vm4, %v904_v38 }
 0x2f8   :  { %s1142_s15 = scalar_lea.vmem %s1487_s28, 16  ;;  %s1146_s16 = scalar_lea.vmem %s1487_s28, 32 }
 0x2f9   :  { %p1143_p8 = scmp.ne.s32.totalorder %s1487_s28, %s1142_s15  ;;  %p1147_p9 = scmp.lt.s32.totalorder %s1487_s28, %s1487_s28 }
 0x2fa   :  { %p1148_p10 = scmp.lt.s32.totalorder %s1146_s16, %s1142_s15 }
 0x2fc   :  { %p1149_p11 = por %p1148_p10, %p1147_p9 }
 0x2fe   :  { %p1150_p12 = pnand %p1149_p11, %p1143_p8 }
 0x300   :  { %1153 = shalt.err (!%p1150_p12)
}
 0x301   :  { %s1154_s19 = scalar_lea.hbm %s1529_s9, 16 }
 0x302   :  { %p1155_p13 = scmp.ne.s32.totalorder %s1529_s9, %s1154_s19  ;;  %p1158_p0 = scmp.lt.u32.totalorder %s1154_s19, %s1529_s9 }
 0x304   :  { %p1160_p1 = pnand %p1158_p0, %p1155_p13 }
 0x306   :  { %1163 = shalt.err (!%p1160_p1)
}
 0x307   :  { %927 = dma.vmem_to_hbm [thread:$0]  %s1487_s28, 16, %s1529_s9, [#allocation6]  }
 0x308   :  { %1164 = dma.done.wait [#allocation4], 16  }
 0x309   :  { %1165 = vsyncadd [#allocation4], 4294967280 }
 0x30a   :  { %1166 = dma.done.wait [#allocation6], 16  }
 0x30b   :  { %1167 = vsyncadd [#allocation6], 4294967280 }
 0x30c   :  { %936 = vsyncpa [#allocation4], 1 }
 0x30d   :  { %937 = vsyncpa [#allocation6], 1 }

</bundles_post_ra>
